<compile_context>
chip_gen: v6e
topology: v6e:2x2x1
jax: 0.10.0
libtpu: 0.0.40
codegen_flags: <defaults>
</compile_context>

<pallas_src>
import functools

import jax
import jax.numpy as jnp
from jax.experimental import pallas as pl
from jax.experimental.pallas import tpu as pltpu

LANES = 128


# --------------------------------------------------------------------------
# 1. Base class: zero penalty.  A constant, not a kernel.
# --------------------------------------------------------------------------
def base_regularization_forward(model=None, inps=None, outs=None, step=0,
                                epoch=0, group=""):
    """Base Regularization penalty: exact 0.0 (additive identity)."""
    return jnp.zeros((), dtype=jnp.float32)


# --------------------------------------------------------------------------
# 2. Concrete-subclass skeleton: tiled sum-of-squares (L2) over activations.
# --------------------------------------------------------------------------
def _sq_sum_kernel(x_ref, acc_ref, *, tiles, tile_rows, valid_rows, ragged,
                   guard_extra):
    c = pl.program_id(0)                      # core-split ("parallel") axis
    i = pl.program_id(1)                      # reduction ("arbitrary") axis
    t = c * pl.num_programs(1) + i            # global tile index

    @pl.when(i == 0)
    def _init():
        acc_ref[...] = jnp.zeros_like(acc_ref)

    def _accumulate(masked):
        # Cast to f32 before squaring: accurate for bf16/fp8 inputs and v5e's
        # VPU has no bf16 path anyway (kernel is HBM-bound, cast is free).
        x = x_ref[...].astype(jnp.float32)
        sq = x * x
        if masked:
            # Only the genuinely-last (partial) tile pays for this mask.
            row_ids = t * tile_rows + jax.lax.broadcasted_iota(
                jnp.int32, (tile_rows, 1), 0)
            sq = jnp.where(row_ids < valid_rows, sq, 0.0)
        # Fold the (tile_rows, 128) tile into a single-vreg (8, 128) partial:
        # pure VPU adds, no cross-lane reduce, and only one vld/vst on the
        # accumulator per tile (instead of one per x-vreg).
        acc_ref[...] += sq.reshape(tile_rows // 8, 8, LANES).sum(axis=0)

    if ragged:
        @pl.when(t < tiles - 1)
        def _full_tiles():
            _accumulate(masked=False)

        @pl.when(t == tiles - 1)
        def _last_partial_tile():
            _accumulate(masked=True)
    elif guard_extra:
        @pl.when(t < tiles)
        def _valid_tiles():
            _accumulate(masked=False)
    else:
        _accumulate(masked=False)


def l2_activation_penalty(inps: jax.Array, *, tile_rows: int = 8192) -> jax.Array:
    """sum(inps**2) via a tiled Pallas reduction (structure for subclasses)."""
    flat = inps.reshape(-1)
    n = int(flat.shape[0])
    rows = n // LANES                        # complete 128-wide rows
    n_main = rows * LANES

    # <128-element ragged tail handled with plain XLA (no full-array jnp.pad,
    # which would roughly triple the HBM traffic of a mem-bound kernel).
    if n_main < n:
        tail_sq = jnp.sum(flat[n_main:].astype(jnp.float32) ** 2)
    else:
        tail_sq = jnp.zeros((), dtype=jnp.float32)
    if rows == 0:
        return tail_sq

    itemsize = jnp.dtype(inps.dtype).itemsize
    sub = 8 * max(1, 4 // itemsize)          # sublane packing for <32-bit dtypes
    tr = min(int(tile_rows), ((rows + sub - 1) // sub) * sub)
    tr = max(sub, (tr // sub) * sub)

    tiles = -(-rows // tr)
    ragged = (rows % tr) != 0
    # Leading "parallel" axis lets v7x's two TensorCores each stream half the
    # rows; on 1-TC v5e/v6e it is just a trivially small extra grid axis.
    num_cores = 2 if tiles >= 2 else 1
    tiles_per_core = -(-tiles // num_cores)
    guard_extra = num_cores * tiles_per_core > tiles   # odd tile count

    if guard_extra:
        # The single "extra" program re-reads the last valid tile (clamped
        # index) and is skipped inside the kernel, so nothing is double-counted.
        in_index = lambda c, i: (jnp.minimum(c * tiles_per_core + i, tiles - 1), 0)
    else:
        in_index = lambda c, i: (c * tiles_per_core + i, 0)

    slab = flat[:n_main].reshape(rows, LANES)

    kernel = functools.partial(
        _sq_sum_kernel, tiles=tiles, tile_rows=tr, valid_rows=rows,
        ragged=ragged, guard_extra=guard_extra)

    partials = pl.pallas_call(
        kernel,
        out_shape=jax.ShapeDtypeStruct((num_cores * 8, LANES), jnp.float32),
        grid=(num_cores, tiles_per_core),
        in_specs=[pl.BlockSpec((tr, LANES), in_index)],
        # The output block doubles as the per-core accumulator: it stays
        # resident across the "arbitrary" reduction axis.
        out_specs=pl.BlockSpec((8, LANES), lambda c, i: (c, 0)),
        compiler_params=pltpu.CompilerParams(
            dimension_semantics=("parallel", "arbitrary")),
        cost_estimate=pl.CostEstimate(
            flops=2 * n_main,
            transcendentals=0,
            bytes_accessed=n_main * itemsize),
    )(slab)

    # Tiny final cross-lane reduce (num_cores*8 x 128 f32) in the wrapper.
    return jnp.sum(partials) + tail_sq


if __name__ == "__main__":
    key = jax.random.PRNGKey(0)

    # Small NCHW activations, consistent with a conv-net regularizer.
    x = jax.random.normal(key, (2, 4, 16, 16), dtype=jnp.float32)

    # --- base class: exact zero penalty ------------------------------------
    penalty = base_regularization_forward(model=None, inps=x, outs=None,
                                          step=0, epoch=0)
    jax.block_until_ready(penalty)
    assert penalty.shape == ()
    assert float(penalty) == 0.0

    # --- subclass skeleton: tiled L2 reduction vs pure JAX ------------------
    l2 = l2_activation_penalty(x)
    jax.block_until_ready(l2)
    ref = jnp.sum(x.astype(jnp.float32) ** 2)
    assert jnp.allclose(l2, ref, rtol=1e-5, atol=1e-5), (float(l2), float(ref))

    # Ragged numel (% 128 != 0) exercises the wrapper tail + last-tile mask.
    y = jax.random.normal(jax.random.PRNGKey(1), (3, 5, 7, 11),
                          dtype=jnp.float32)
    l2_y = l2_activation_penalty(y)
    jax.block_until_ready(l2_y)
    ref_y = jnp.sum(y.astype(jnp.float32) ** 2)
    assert jnp.allclose(l2_y, ref_y, rtol=1e-5, atol=1e-5), (float(l2_y),
                                                             float(ref_y))

    # Multi-tile, odd tile count: exercises the 2-core split, the clamped
    # "extra" program and the gated partial-tile mask.
    z = jax.random.normal(jax.random.PRNGKey(2), (50, 128), dtype=jnp.float32)
    l2_z = l2_activation_penalty(z, tile_rows=8)
    jax.block_until_ready(l2_z)
    ref_z = jnp.sum(z.astype(jnp.float32) ** 2)
    assert jnp.allclose(l2_z, ref_z, rtol=1e-5, atol=1e-5), (float(l2_z),
                                                             float(ref_z))

    # bf16 activations: f32 cast-then-square path.
    w = jax.random.normal(jax.random.PRNGKey(3), (2, 4, 16, 16),
                          dtype=jnp.float32).astype(jnp.bfloat16)
    l2_w = l2_activation_penalty(w)
    jax.block_until_ready(l2_w)
    ref_w = jnp.sum(w.astype(jnp.float32) ** 2)
    assert jnp.allclose(l2_w, ref_w, rtol=1e-4, atol=1e-4), (float(l2_w),
                                                             float(ref_w))

    print("KERNEL_OK")
</pallas_src>

<mosaic_0001>
module attributes {stable_mosaic.version = 11 : i64} {
  func.func @_sq_sum_kernel(%arg0: i32, %arg1: i32, %arg2: memref<16x128xf32, #tpu.memory_space<vmem>>, %arg3: memref<8x128xf32, #tpu.memory_space<vmem>>) attributes {dimension_semantics = [#tpu.dimension_semantics<parallel>, #tpu.dimension_semantics<arbitrary>], iteration_bounds = array<i64: 1, 1>, scalar_prefetch = 0 : i64, scratch_operands = 0 : i64, tpu.core_type = #tpu.core_type<tc>, window_params = [{transform_indices = @transform_0, window_bounds = array<i64: 16, 128>}, {transform_indices = @transform_1, window_bounds = array<i64: 8, 128>}]} {
    %c0_i32 = arith.constant 0 : i32
    %0 = arith.cmpi eq, %arg1, %c0_i32 : i32
    %1 = arith.extui %0 : i1 to i32
    %c0_i32_0 = arith.constant 0 : i32
    %2 = arith.cmpi ne, %1, %c0_i32_0 : i32
    scf.if %2 {
      %cst_6 = arith.constant 0.000000e+00 : f32
      %10 = vector.broadcast %cst_6 : f32 to vector<8x128xf32>
      %c0_7 = arith.constant 0 : index
      %c0_8 = arith.constant 0 : index
      %11 = vector.load %arg3[%c0_7, %c0_8] : memref<8x128xf32, #tpu.memory_space<vmem>>, vector<8x128xf32>
      tpu.vector_store %arg3[%c0_7, %c0_8], %10 {strides = array<i32>} : memref<8x128xf32, #tpu.memory_space<vmem>>, vector<8x128xf32>,
    } else {
    }
    %c0 = arith.constant 0 : index
    %c0_1 = arith.constant 0 : index
    %3 = vector.load %arg2[%c0, %c0_1] : memref<16x128xf32, #tpu.memory_space<vmem>>, vector<16x128xf32>
    %4 = arith.mulf %3, %3 : vector<16x128xf32>
    %c0_2 = arith.constant 0 : index
    %c0_3 = arith.constant 0 : index
    %5 = vector.load %arg3[%c0_2, %c0_3] : memref<8x128xf32, #tpu.memory_space<vmem>>, vector<8x128xf32>
    %6 = vector.shape_cast %4 : vector<16x128xf32> to vector<2x8x128xf32>
    %cst = arith.constant dense<0.000000e+00> : vector<8x128xf32>
    %7 = vector.multi_reduction <add>, %6, %cst [0] : vector<2x8x128xf32> to vector<8x128xf32>
    %8 = arith.addf %5, %7 : vector<8x128xf32>
    %c0_4 = arith.constant 0 : index
    %c0_5 = arith.constant 0 : index
    %9 = vector.load %arg3[%c0_4, %c0_5] : memref<8x128xf32, #tpu.memory_space<vmem>>, vector<8x128xf32>
    tpu.vector_store %arg3[%c0_4, %c0_5], %8 {strides = array<i32>} : memref<8x128xf32, #tpu.memory_space<vmem>>, vector<8x128xf32>,
    return
  }
  func.func @transform_0(%arg0: i32, %arg1: i32) -> (i32, i32) {
    %c1_i32 = arith.constant 1 : i32
    %0 = arith.muli %arg0, %c1_i32 : i32
    %1 = arith.addi %0, %arg1 : i32
    %c0_i32 = arith.constant 0 : i32
    %c0_i32_0 = arith.constant 0 : i32
    return %1, %c0_i32 : i32, i32
  }
  func.func @transform_1(%arg0: i32, %arg1: i32) -> (i32, i32) {
    %c0_i32 = arith.constant 0 : i32
    %c0_i32_0 = arith.constant 0 : i32
    return %arg0, %c0_i32 : i32, i32
  }
}

</mosaic_0001>

<bundles_post_ra>
// kernel: tpu_custom_call.1
= control target key start
LH: loop header
LB: loop body
LE: loop exit
PB: predicated region body
PF: predicated region fallthrough
CT: control target
= control target key end

     0   :  { %6 = vsyncpa [#allocation3], 0  ;;  %s126_s0 = inlined_call_operand.hbm [shape: f32[16,128], index: 0, kind: input, shape index: {}]   ;;  %s127_s1 = inlined_call_operand.hbm [shape: f32[8,128], index: 1, kind: output, shape index: {}]  }
   0x1   :  { %7 = vsyncpa [#allocation4], 0  ;;  %s106_s6 = smov [#allocation2]  }
   0x2   :  { %s17_s7 = sshll.u32 %s106_s6, 4  ;;  %s18_s7 = int_to_ptr.vmem [resolvable:$true] %s17_s7 }
   0x3   :  { %s70_s8 = scalar_lea.vmem %s18_s7, 256  ;;  %p75_p1 = scmp.lt.s32.totalorder %s18_s7, %s18_s7 }
   0x4   :  { %p71_p0 = scmp.ne.s32.totalorder %s18_s7, %s70_s8  ;;  %p76_p2 = scmp.lt.s32.totalorder %s70_s8, %s70_s8 }
   0x6   :  { %p77_p3 = por %p76_p2, %p75_p1 }
   0x8   :  { %p78_p4 = pnand %p77_p3, %p71_p0 }
   0xa   :  { %81 = shalt.err (!%p78_p4)
}
   0xb   :  { %s107_s9 = smov 128   ;;  %s108_s10 = smov 8  }
   0xc   :  { %23 = dma.hbm_to_vmem [thread:$0]  %s126_s0, 256, %s18_s7, [#allocation3], %s107_s9, %s107_s9, %s108_s10  }
   0xd   :  { %102 = dma.done.wait [#allocation3], 256  }
   0xe   :  { %103 = vsyncadd [#allocation3], 4294967040  ;;  %v34_v0 = vld [vmem:[#allocation2] sm:$0xff]  ;;  %v35_v1 = vld [vmem:[#allocation2 + $0x8] sm:$0xff]  ;;  %s109_s13 = smov [#allocation5]  }
   0xf   :  { %v36_v2 = vmul.f32 %v34_v0, %v34_v0  ;;  %v37_v3 = vmul.f32 %v35_v1, %v35_v1  ;;  %s48_s14 = sshll.u32 %s109_s13, 4  ;;  %s49_s14 = int_to_ptr.vmem [resolvable:$true] %s48_s14 }
  0x10   :  { %s82_s15 = scalar_lea.vmem %s49_s14, 128  ;;  %p87_p6 = scmp.lt.s32.totalorder %s49_s14, %s49_s14 }
  0x11   :  { %v39_v4 = vadd.f32 %v37_v3, %v36_v2  ;;  %p83_p5 = scmp.ne.s32.totalorder %s49_s14, %s82_s15  ;;  %p88_p7 = scmp.lt.s32.totalorder %s82_s15, %s82_s15 }
  0x13   :  { %41 = vst [vmem:[#allocation5] sm:$0xff] %v39_v4  ;;  %p89_p8 = por %p88_p7, %p87_p6 }
  0x15   :  { %p90_p9 = pnand %p89_p8, %p83_p5 }
  0x17   :  { %93 = shalt.err (!%p90_p9)
}
  0x18   :  { %51 = dma.vmem_to_hbm [thread:$0]  %s49_s14, 128, %s127_s1, [#allocation4]  }
  0x19   :  { %104 = dma.done.wait [#allocation4], 128  }
  0x1a   :  { %105 = vsyncadd [#allocation4], 4294967168 }
  0x1b   :  { %55 = vsyncpa [#allocation3], 1 }
  0x1c   :  { %56 = vsyncpa [#allocation4], 1 }

</bundles_post_ra>
